<compile_context>
chip_gen: v5e
topology: v5e:2x2
jax: 0.10.0
libtpu: 0.0.40
codegen_flags: <defaults>
</compile_context>

<pallas_src>
import jax
import jax.numpy as jnp
from jax.experimental import pallas as pl
from jax.experimental.pallas import tpu as pltpu

EPS = 1e-5
HIGHEST = jax.lax.Precision.HIGHEST


# ----------------------------- Pallas kernel --------------------------------

def _make_unet_enc_kernel(H, W, feat):
    Hp, Wp = H + 2, W + 2          # zero-padded frame (3x3 conv, pad=1)
    Lp = Hp * Wp                   # flattened padded spatial dim (lane dim)
    G = Wp + 1                     # guard band: every tap is a static slice
    Lq = Lp + 2 * G
    # flat lane offsets of the 9 taps of a 3x3 kernel (row stride = Wp)
    offs = tuple(du * Wp + dv for du in (-1, 0, 1) for dv in (-1, 0, 1))

    def kernel(xq_ref, mask_ref, w1_ref, w2_ref, wt_ref,
               s1_ref, b1_ref, s2_ref, b2_ref, st_ref, bt_ref,
               o_ref, h1q_ref):
        # xq_ref : (1, Cin, Lq) f32  image, frame + guard zero-padded
        # mask   : (1, Lp)      f32  1 at interior pixels, 0 on the frame
        # w1     : (F, 9*Cin)   bf16 3x3 taps folded into K
        # w2     : (F, 9*F)     bf16
        # wt     : (4*Cout, F)  bf16 row = (dy*2+dx)*Cout + c
        # s*/b*  : per-row BN scale/shift (convT bias folded into bt)
        # o_ref  : (1, 4*Cout, Lp) f32
        # h1q_ref: (F, Lq) f32 VMEM scratch (guarded copy of h1 for conv2 taps)

        def conv3x3(load_tap, w, scale, shift):
            # single (rows, 9*C) x (9*C, Lp) MXU matmul; taps folded into K
            p = jnp.concatenate([load_tap(o) for o in offs], axis=0)
            y = jnp.dot(w, p.astype(jnp.bfloat16),
                        preferred_element_type=jnp.float32)
            return jnp.maximum(y * scale + shift, 0.0)

        # conv1 + BN + ReLU                                        (F, Lp)
        h1 = conv3x3(lambda o: xq_ref[0, :, G + o:G + o + Lp],
                     w1_ref[...], s1_ref[...], b1_ref[...])

        # stage h1 (frame zeroed) into a guarded buffer for conv2's taps
        h1q_ref[...] = jnp.zeros((feat, Lq), jnp.float32)
        h1q_ref[:, G:G + Lp] = h1 * mask_ref[...]

        # conv2 + BN + ReLU + residual                             (F, Lp)
        h2 = conv3x3(lambda o: h1q_ref[:, G + o:G + o + Lp],
                     w2_ref[...], s2_ref[...], b2_ref[...]) + h1

        # ConvTranspose2d(k=2, s=2) + BN + ReLU: the 4 (dy,dx) sub-grids are
        # independent rows of one (4*Cout, F) x (F, Lp) matmul.
        yt = jnp.dot(wt_ref[...], h2.astype(jnp.bfloat16),
                     preferred_element_type=jnp.float32)
        o_ref[0] = jnp.maximum(yt * st_ref[...] + bt_ref[...], 0.0)

    return kernel, Lp, Lq, G


# ------------------------------ JAX wrapper ----------------------------------

def _bn_fold(gamma, beta, mean, var):
    scale = gamma / jnp.sqrt(var + EPS)
    return scale, beta - mean * scale


def unet_enc_forward(x_nchw, p):
    n, cin, H, W = x_nchw.shape
    feat = p["w1"].shape[0]
    cout = p["wt"].shape[1]
    Hp, Wp = H + 2, W + 2
    kernel, Lp, Lq, G = _make_unet_enc_kernel(H, W, feat)

    # image: zero frame (conv pad=1), flatten HW, add guard bands in lanes
    xq = jnp.pad(x_nchw, ((0, 0), (0, 0), (1, 1), (1, 1))).reshape(n, cin, Lp)
    xq = jnp.pad(xq, ((0, 0), (0, 0), (G, G)))

    # interior-pixel mask on the padded-flattened domain
    interior = jnp.zeros((Hp, Wp), jnp.float32).at[1:-1, 1:-1].set(1.0)
    interior = interior.reshape(1, Lp)

    # weights with the 3x3 / 2x2 taps folded into matmul dims, bf16 for MXU
    w1 = jnp.transpose(p["w1"], (0, 2, 3, 1)).reshape(feat, 9 * cin)
    w2 = jnp.transpose(p["w2"], (0, 2, 3, 1)).reshape(feat, 9 * feat)
    wt = jnp.transpose(p["wt"], (2, 3, 1, 0)).reshape(4 * cout, feat)
    w1, w2, wt = (w.astype(jnp.bfloat16) for w in (w1, w2, wt))

    # fold BN into per-channel scale/shift; fold convT bias into shift3
    s1, b1 = _bn_fold(*p["bn1"])
    s2, b2 = _bn_fold(*p["bn2"])
    s3, b3 = _bn_fold(*p["bn3"])
    st = jnp.tile(s3, 4)[:, None]
    bt = jnp.tile(p["bt"] * s3 + b3, 4)[:, None]
    s1, b1, s2, b2 = (v[:, None] for v in (s1, b1, s2, b2))

    def full(shape):
        return pl.BlockSpec(shape, lambda i: (0,) * len(shape))

    out = pl.pallas_call(
        kernel,
        out_shape=jax.ShapeDtypeStruct((n, 4 * cout, Lp), jnp.float32),
        grid=(n,),
        in_specs=[
            pl.BlockSpec((1, cin, Lq), lambda i: (i, 0, 0)),
            full((1, Lp)),
            full((feat, 9 * cin)),
            full((feat, 9 * feat)),
            full((4 * cout, feat)),
            full((feat, 1)), full((feat, 1)),
            full((feat, 1)), full((feat, 1)),
            full((4 * cout, 1)), full((4 * cout, 1)),
        ],
        out_specs=pl.BlockSpec((1, 4 * cout, Lp), lambda i: (i, 0, 0)),
        scratch_shapes=[pltpu.VMEM((feat, Lq), jnp.float32)],
        compiler_params=pltpu.CompilerParams(
            dimension_semantics=("parallel",)),
    )(xq, interior, w1, w2, wt, s1, b1, s2, b2, st, bt)

    # (N, (dy,dx,c), Hp*Wp) -> crop the frame and interleave the 2x2 sub-grids
    y = out.reshape(n, 2, 2, cout, Hp, Wp)[:, :, :, :, 1:-1, 1:-1]
    y = jnp.transpose(y, (0, 3, 4, 1, 5, 2)).reshape(n, cout, 2 * H, 2 * W)
    return y


# ----------------------- deterministic parameter init ------------------------

def init_params(key, in_channels, features, out_channels):
    ks = jax.random.split(key, 7)

    def bn(k, c):
        k1, k2, k3, k4 = jax.random.split(k, 4)
        gamma = 1.0 + 0.1 * jax.random.normal(k1, (c,), jnp.float32)
        beta = 0.1 * jax.random.normal(k2, (c,), jnp.float32)
        mean = 0.1 * jax.random.normal(k3, (c,), jnp.float32)
        var = 1.0 + 0.5 * jax.random.uniform(k4, (c,), jnp.float32)
        return gamma, beta, mean, var

    w1 = 0.2 * jax.random.normal(ks[0], (features, in_channels, 3, 3), jnp.float32)
    w2 = 0.2 * jax.random.normal(ks[1], (features, features, 3, 3), jnp.float32)
    wt = 0.2 * jax.random.normal(ks[2], (features, out_channels, 2, 2), jnp.float32)
    bt = 0.1 * jax.random.normal(ks[3], (out_channels,), jnp.float32)
    return dict(w1=w1, bn1=bn(ks[4], features),
                w2=w2, bn2=bn(ks[5], features),
                wt=wt, bt=bt, bn3=bn(ks[6], out_channels))


# ----------------------------- pure-XLA reference ----------------------------

def reference_forward(x_nchw, p, *, op_dtype=jnp.float32, precision=HIGHEST):
    """op_dtype=bf16 + DEFAULT reproduces the kernel's operand precision
    (f32 accumulation) for a tight structural check; f32 + HIGHEST is the
    true-precision reference."""

    def conv_bn_relu(h, w, bnp):
        g, b, m, v = bnp
        y = jax.lax.conv_general_dilated(
            h.astype(op_dtype), w.astype(op_dtype), (1, 1), ((1, 1), (1, 1)),
            dimension_numbers=("NCHW", "OIHW", "NCHW"),
            precision=precision, preferred_element_type=jnp.float32)
        y = (y - m[:, None, None]) / jnp.sqrt(v + EPS)[:, None, None] \
            * g[:, None, None] + b[:, None, None]
        return jnp.maximum(y, 0.0)

    h1 = conv_bn_relu(x_nchw, p["w1"], p["bn1"])
    h2 = conv_bn_relu(h1, p["w2"], p["bn2"]) + h1

    n, feat, H, W = h2.shape
    cout = p["wt"].shape[1]
    t = jnp.einsum("nfhw,fcuv->nchuwv",
                   h2.astype(op_dtype), p["wt"].astype(op_dtype),
                   precision=precision, preferred_element_type=jnp.float32)
    t = t.reshape(n, cout, 2 * H, 2 * W) + p["bt"][:, None, None]
    g, b, m, v = p["bn3"]
    t = (t - m[:, None, None]) / jnp.sqrt(v + EPS)[:, None, None] \
        * g[:, None, None] + b[:, None, None]
    return jnp.maximum(t, 0.0)


# ----------------------------------- main -------------------------------------

if __name__ == "__main__":
    key = jax.random.PRNGKey(0)
    kx, kp = jax.random.split(key)
    N, CIN, FEAT, COUT, H, W = 2, 4, 8, 4, 16, 16

    x = jax.random.normal(kx, (N, CIN, H, W), dtype=jnp.float32)
    params = init_params(kp, CIN, FEAT, COUT)

    out = jax.jit(unet_enc_forward)(x, params)
    out = jax.block_until_ready(out)
    assert out.shape == (N, COUT, 2 * H, 2 * W), out.shape

    # Tight check: reference with the same operand precision as the kernel
    # (bf16 MXU inputs, f32 accumulation) -> differences are order-of-sum only.
    ref_bf16 = reference_forward(x, params, op_dtype=jnp.bfloat16,
                                 precision=jax.lax.Precision.DEFAULT)
    err_tight = float(jnp.max(jnp.abs(out - ref_bf16)))
    assert jnp.allclose(out, ref_bf16, atol=2e-3, rtol=2e-3), err_tight

    # Loose check vs. full-f32/HIGHEST reference: bf16-operand numerics budget.
    ref_f32 = reference_forward(x, params)
    err_f32 = float(jnp.max(jnp.abs(out - ref_f32)))
    assert jnp.allclose(out, ref_f32, atol=1.5e-1, rtol=5e-2), err_f32

    print("KERNEL_OK")
</pallas_src>

<mosaic_0001>
module attributes {stable_mosaic.version = 11 : i64} {
  func.func @kernel(%arg0: i32, %arg1: memref<1x4x362xf32, #tpu.memory_space<vmem>>, %arg2: memref<1x324xf32, #tpu.memory_space<vmem>>, %arg3: memref<8x36xbf16, #tpu.memory_space<vmem>>, %arg4: memref<8x72xbf16, #tpu.memory_space<vmem>>, %arg5: memref<16x8xbf16, #tpu.memory_space<vmem>>, %arg6: memref<8x1xf32, #tpu.memory_space<vmem>>, %arg7: memref<8x1xf32, #tpu.memory_space<vmem>>, %arg8: memref<8x1xf32, #tpu.memory_space<vmem>>, %arg9: memref<8x1xf32, #tpu.memory_space<vmem>>, %arg10: memref<16x1xf32, #tpu.memory_space<vmem>>, %arg11: memref<16x1xf32, #tpu.memory_space<vmem>>, %arg12: memref<1x16x324xf32, #tpu.memory_space<vmem>>, %arg13: memref<8x362xf32, #tpu.memory_space<vmem>>) attributes {dimension_semantics = [#tpu.dimension_semantics<parallel>], iteration_bounds = array<i64: 2>, scalar_prefetch = 0 : i64, scratch_operands = 1 : i64, tpu.core_type = #tpu.core_type<tc>, window_params = [{transform_indices = @transform_0, window_bounds = array<i64: 1, 4, 362>}, {pipeline_mode = #tpu.pipeline_mode<synchronous>, transform_indices = @transform_1, window_bounds = array<i64: 1, 324>}, {pipeline_mode = #tpu.pipeline_mode<synchronous>, transform_indices = @transform_2, window_bounds = array<i64: 8, 36>}, {pipeline_mode = #tpu.pipeline_mode<synchronous>, transform_indices = @transform_3, window_bounds = array<i64: 8, 72>}, {pipeline_mode = #tpu.pipeline_mode<synchronous>, transform_indices = @transform_4, window_bounds = array<i64: 16, 8>}, {pipeline_mode = #tpu.pipeline_mode<synchronous>, transform_indices = @transform_5, window_bounds = array<i64: 8, 1>}, {pipeline_mode = #tpu.pipeline_mode<synchronous>, transform_indices = @transform_6, window_bounds = array<i64: 8, 1>}, {pipeline_mode = #tpu.pipeline_mode<synchronous>, transform_indices = @transform_7, window_bounds = array<i64: 8, 1>}, {pipeline_mode = #tpu.pipeline_mode<synchronous>, transform_indices = @transform_8, window_bounds = array<i64: 8, 1>}, {pipeline_mode = #tpu.pipeline_mode<synchronous>, transform_indices = @transform_9, window_bounds = array<i64: 16, 1>}, {pipeline_mode = #tpu.pipeline_mode<synchronous>, transform_indices = @transform_10, window_bounds = array<i64: 16, 1>}, {transform_indices = @transform_11, window_bounds = array<i64: 1, 16, 324>}]} {
    %c0 = arith.constant 0 : index
    %c0_0 = arith.constant 0 : index
    %0 = vector.load %arg3[%c0, %c0_0] : memref<8x36xbf16, #tpu.memory_space<vmem>>, vector<8x36xbf16>
    %c0_1 = arith.constant 0 : index
    %c0_2 = arith.constant 0 : index
    %1 = vector.load %arg6[%c0_1, %c0_2] : memref<8x1xf32, #tpu.memory_space<vmem>>, vector<8x1xf32>
    %c0_3 = arith.constant 0 : index
    %c0_4 = arith.constant 0 : index
    %2 = vector.load %arg7[%c0_3, %c0_4] : memref<8x1xf32, #tpu.memory_space<vmem>>, vector<8x1xf32>
    %c0_5 = arith.constant 0 : index
    %c0_6 = arith.constant 0 : index
    %c0_7 = arith.constant 0 : index
    %3 = vector.load %arg1[%c0_5, %c0_6, %c0_7] : memref<1x4x362xf32, #tpu.memory_space<vmem>>, vector<1x4x324xf32>
    %4 = vector.shape_cast %3 : vector<1x4x324xf32> to vector<4x324xf32>
    %c0_8 = arith.constant 0 : index
    %c0_9 = arith.constant 0 : index
    %c1 = arith.constant 1 : index
    %5 = vector.load %arg1[%c0_8, %c0_9, %c1] : memref<1x4x362xf32, #tpu.memory_space<vmem>>, vector<1x4x324xf32>
    %6 = vector.shape_cast %5 : vector<1x4x324xf32> to vector<4x324xf32>
    %c0_10 = arith.constant 0 : index
    %c0_11 = arith.constant 0 : index
    %c2 = arith.constant 2 : index
    %7 = vector.load %arg1[%c0_10, %c0_11, %c2] : memref<1x4x362xf32, #tpu.memory_space<vmem>>, vector<1x4x324xf32>
    %8 = vector.shape_cast %7 : vector<1x4x324xf32> to vector<4x324xf32>
    %c0_12 = arith.constant 0 : index
    %c0_13 = arith.constant 0 : index
    %c18 = arith.constant 18 : index
    %9 = vector.load %arg1[%c0_12, %c0_13, %c18] : memref<1x4x362xf32, #tpu.memory_space<vmem>>, vector<1x4x324xf32>
    %10 = vector.shape_cast %9 : vector<1x4x324xf32> to vector<4x324xf32>
    %c0_14 = arith.constant 0 : index
    %c0_15 = arith.constant 0 : index
    %c19 = arith.constant 19 : index
    %11 = vector.load %arg1[%c0_14, %c0_15, %c19] : memref<1x4x362xf32, #tpu.memory_space<vmem>>, vector<1x4x324xf32>
    %12 = vector.shape_cast %11 : vector<1x4x324xf32> to vector<4x324xf32>
    %c0_16 = arith.constant 0 : index
    %c0_17 = arith.constant 0 : index
    %c20 = arith.constant 20 : index
    %13 = vector.load %arg1[%c0_16, %c0_17, %c20] : memref<1x4x362xf32, #tpu.memory_space<vmem>>, vector<1x4x324xf32>
    %14 = vector.shape_cast %13 : vector<1x4x324xf32> to vector<4x324xf32>
    %c0_18 = arith.constant 0 : index
    %c0_19 = arith.constant 0 : index
    %c36 = arith.constant 36 : index
    %15 = vector.load %arg1[%c0_18, %c0_19, %c36] : memref<1x4x362xf32, #tpu.memory_space<vmem>>, vector<1x4x324xf32>
    %16 = vector.shape_cast %15 : vector<1x4x324xf32> to vector<4x324xf32>
    %c0_20 = arith.constant 0 : index
    %c0_21 = arith.constant 0 : index
    %c37 = arith.constant 37 : index
    %17 = vector.load %arg1[%c0_20, %c0_21, %c37] : memref<1x4x362xf32, #tpu.memory_space<vmem>>, vector<1x4x324xf32>
    %18 = vector.shape_cast %17 : vector<1x4x324xf32> to vector<4x324xf32>
    %c0_22 = arith.constant 0 : index
    %c0_23 = arith.constant 0 : index
    %c38 = arith.constant 38 : index
    %19 = vector.load %arg1[%c0_22, %c0_23, %c38] : memref<1x4x362xf32, #tpu.memory_space<vmem>>, vector<1x4x324xf32>
    %20 = vector.shape_cast %19 : vector<1x4x324xf32> to vector<4x324xf32>
    %21 = tpu.concatenate %4, %6, %8, %10, %12, %14, %16, %18, %20 in 0 : vector<4x324xf32>, vector<4x324xf32>, vector<4x324xf32>, vector<4x324xf32>, vector<4x324xf32>, vector<4x324xf32>, vector<4x324xf32>, vector<4x324xf32>, vector<4x324xf32> -> vector<36x324xf32>
    %22 = arith.truncf %21 : vector<36x324xf32> to vector<36x324xbf16>
    %cst = arith.constant dense<0.000000e+00> : vector<8x324xf32>
    %23 = tpu.matmul %0, %22, %cst {dimension_numbers = #tpu.dot_dimension_numbers<[1], [0], [0], [1], [0, 0, 1, 1], [], []>} : vector<8x36xbf16>, vector<36x324xbf16>, vector<8x324xf32> -> vector<8x324xf32>
    %24 = vector.broadcast %1 : vector<8x1xf32> to vector<8x324xf32>
    %25 = arith.mulf %23, %24 : vector<8x324xf32>
    %26 = vector.broadcast %2 : vector<8x1xf32> to vector<8x324xf32>
    %27 = arith.addf %25, %26 : vector<8x324xf32>
    %cst_24 = arith.constant 0.000000e+00 : f32
    %28 = vector.broadcast %cst_24 : f32 to vector<8x324xf32>
    %29 = arith.maximumf %27, %28 : vector<8x324xf32>
    %cst_25 = arith.constant 0.000000e+00 : f32
    %30 = vector.broadcast %cst_25 : f32 to vector<8x362xf32>
    %c0_26 = arith.constant 0 : index
    %c0_27 = arith.constant 0 : index
    %31 = vector.load %arg13[%c0_26, %c0_27] : memref<8x362xf32, #tpu.memory_space<vmem>>, vector<8x362xf32>
    tpu.vector_store %arg13[%c0_26, %c0_27], %30 {strides = array<i32>} : memref<8x362xf32, #tpu.memory_space<vmem>>, vector<8x362xf32>,
    %c0_28 = arith.constant 0 : index
    %c0_29 = arith.constant 0 : index
    %32 = vector.load %arg2[%c0_28, %c0_29] : memref<1x324xf32, #tpu.memory_space<vmem>>, vector<1x324xf32>
    %33 = vector.broadcast %32 : vector<1x324xf32> to vector<8x324xf32>
    %34 = arith.mulf %29, %33 : vector<8x324xf32>
    %c0_30 = arith.constant 0 : index
    %c19_31 = arith.constant 19 : index
    %35 = vector.load %arg13[%c0_30, %c19_31] : memref<8x362xf32, #tpu.memory_space<vmem>>, vector<8x324xf32>
    tpu.vector_store %arg13[%c0_30, %c19_31], %34 {strides = array<i32>} : memref<8x362xf32, #tpu.memory_space<vmem>>, vector<8x324xf32>,
    %c0_32 = arith.constant 0 : index
    %c0_33 = arith.constant 0 : index
    %36 = vector.load %arg4[%c0_32, %c0_33] : memref<8x72xbf16, #tpu.memory_space<vmem>>, vector<8x72xbf16>
    %c0_34 = arith.constant 0 : index
    %c0_35 = arith.constant 0 : index
    %37 = vector.load %arg8[%c0_34, %c0_35] : memref<8x1xf32, #tpu.memory_space<vmem>>, vector<8x1xf32>
    %c0_36 = arith.constant 0 : index
    %c0_37 = arith.constant 0 : index
    %38 = vector.load %arg9[%c0_36, %c0_37] : memref<8x1xf32, #tpu.memory_space<vmem>>, vector<8x1xf32>
    %c0_38 = arith.constant 0 : index
    %c0_39 = arith.constant 0 : index
    %39 = vector.load %arg13[%c0_38, %c0_39] : memref<8x362xf32, #tpu.memory_space<vmem>>, vector<8x324xf32>
    %c0_40 = arith.constant 0 : index
    %c1_41 = arith.constant 1 : index
    %40 = vector.load %arg13[%c0_40, %c1_41] : memref<8x362xf32, #tpu.memory_space<vmem>>, vector<8x324xf32>
    %c0_42 = arith.constant 0 : index
    %c2_43 = arith.constant 2 : index
    %41 = vector.load %arg13[%c0_42, %c2_43] : memref<8x362xf32, #tpu.memory_space<vmem>>, vector<8x324xf32>
    %c0_44 = arith.constant 0 : index
    %c18_45 = arith.constant 18 : index
    %42 = vector.load %arg13[%c0_44, %c18_45] : memref<8x362xf32, #tpu.memory_space<vmem>>, vector<8x324xf32>
    %c0_46 = arith.constant 0 : index
    %c19_47 = arith.constant 19 : index
    %43 = vector.load %arg13[%c0_46, %c19_47] : memref<8x362xf32, #tpu.memory_space<vmem>>, vector<8x324xf32>
    %c0_48 = arith.constant 0 : index
    %c20_49 = arith.constant 20 : index
    %44 = vector.load %arg13[%c0_48, %c20_49] : memref<8x362xf32, #tpu.memory_space<vmem>>, vector<8x324xf32>
    %c0_50 = arith.constant 0 : index
    %c36_51 = arith.constant 36 : index
    %45 = vector.load %arg13[%c0_50, %c36_51] : memref<8x362xf32, #tpu.memory_space<vmem>>, vector<8x324xf32>
    %c0_52 = arith.constant 0 : index
    %c37_53 = arith.constant 37 : index
    %46 = vector.load %arg13[%c0_52, %c37_53] : memref<8x362xf32, #tpu.memory_space<vmem>>, vector<8x324xf32>
    %c0_54 = arith.constant 0 : index
    %c38_55 = arith.constant 38 : index
    %47 = vector.load %arg13[%c0_54, %c38_55] : memref<8x362xf32, #tpu.memory_space<vmem>>, vector<8x324xf32>
    %48 = tpu.concatenate %39, %40, %41, %42, %43, %44, %45, %46, %47 in 0 : vector<8x324xf32>, vector<8x324xf32>, vector<8x324xf32>, vector<8x324xf32>, vector<8x324xf32>, vector<8x324xf32>, vector<8x324xf32>, vector<8x324xf32>, vector<8x324xf32> -> vector<72x324xf32>
    %49 = arith.truncf %48 : vector<72x324xf32> to vector<72x324xbf16>
    %cst_56 = arith.constant dense<0.000000e+00> : vector<8x324xf32>
    %50 = tpu.matmul %36, %49, %cst_56 {dimension_numbers = #tpu.dot_dimension_numbers<[1], [0], [0], [1], [0, 0, 1, 1], [], []>} : vector<8x72xbf16>, vector<72x324xbf16>, vector<8x324xf32> -> vector<8x324xf32>
    %51 = vector.broadcast %37 : vector<8x1xf32> to vector<8x324xf32>
    %52 = arith.mulf %50, %51 : vector<8x324xf32>
    %53 = vector.broadcast %38 : vector<8x1xf32> to vector<8x324xf32>
    %54 = arith.addf %52, %53 : vector<8x324xf32>
    %cst_57 = arith.constant 0.000000e+00 : f32
    %55 = vector.broadcast %cst_57 : f32 to vector<8x324xf32>
    %56 = arith.maximumf %54, %55 : vector<8x324xf32>
    %57 = arith.addf %56, %29 : vector<8x324xf32>
    %c0_58 = arith.constant 0 : index
    %c0_59 = arith.constant 0 : index
    %58 = vector.load %arg5[%c0_58, %c0_59] : memref<16x8xbf16, #tpu.memory_space<vmem>>, vector<16x8xbf16>
    %59 = arith.truncf %57 : vector<8x324xf32> to vector<8x324xbf16>
    %cst_60 = arith.constant dense<0.000000e+00> : vector<16x324xf32>
    %60 = tpu.matmul %58, %59, %cst_60 {dimension_numbers = #tpu.dot_dimension_numbers<[1], [0], [0], [1], [0, 0, 1, 1], [], []>} : vector<16x8xbf16>, vector<8x324xbf16>, vector<16x324xf32> -> vector<16x324xf32>
    %c0_61 = arith.constant 0 : index
    %c0_62 = arith.constant 0 : index
    %61 = vector.load %arg10[%c0_61, %c0_62] : memref<16x1xf32, #tpu.memory_space<vmem>>, vector<16x1xf32>
    %62 = vector.broadcast %61 : vector<16x1xf32> to vector<16x324xf32>
    %63 = arith.mulf %60, %62 : vector<16x324xf32>
    %c0_63 = arith.constant 0 : index
    %c0_64 = arith.constant 0 : index
    %64 = vector.load %arg11[%c0_63, %c0_64] : memref<16x1xf32, #tpu.memory_space<vmem>>, vector<16x1xf32>
    %65 = vector.broadcast %64 : vector<16x1xf32> to vector<16x324xf32>
    %66 = arith.addf %63, %65 : vector<16x324xf32>
    %cst_65 = arith.constant 0.000000e+00 : f32
    %67 = vector.broadcast %cst_65 : f32 to vector<16x324xf32>
    %68 = arith.maximumf %66, %67 : vector<16x324xf32>
    %c0_66 = arith.constant 0 : index
    %c0_67 = arith.constant 0 : index
    %c0_68 = arith.constant 0 : index
    %69 = vector.load %arg12[%c0_66, %c0_67, %c0_68] : memref<1x16x324xf32, #tpu.memory_space<vmem>>, vector<1x16x324xf32>
    %70 = vector.shape_cast %69 : vector<1x16x324xf32> to vector<16x324xf32>
    %71 = vector.shape_cast %68 : vector<16x324xf32> to vector<1x16x324xf32>
    tpu.vector_store %arg12[%c0_66, %c0_67, %c0_68], %71 {strides = array<i32>} : memref<1x16x324xf32, #tpu.memory_space<vmem>>, vector<1x16x324xf32>,
    return
  }
  func.func @transform_0(%arg0: i32) -> (i32, i32, i32) {
    %c0_i32 = arith.constant 0 : i32
    %c0_i32_0 = arith.constant 0 : i32
    %c0_i32_1 = arith.constant 0 : i32
    return %arg0, %c0_i32, %c0_i32_0 : i32, i32, i32
  }
  func.func @transform_1(%arg0: i32) -> (i32, i32) {
    %c0_i32 = arith.constant 0 : i32
    %c0_i32_0 = arith.constant 0 : i32
    %c0_i32_1 = arith.constant 0 : i32
    return %c0_i32, %c0_i32_0 : i32, i32
  }
  func.func @transform_2(%arg0: i32) -> (i32, i32) {
    %c0_i32 = arith.constant 0 : i32
    %c0_i32_0 = arith.constant 0 : i32
    %c0_i32_1 = arith.constant 0 : i32
    return %c0_i32, %c0_i32_0 : i32, i32
  }
  func.func @transform_3(%arg0: i32) -> (i32, i32) {
    %c0_i32 = arith.constant 0 : i32
    %c0_i32_0 = arith.constant 0 : i32
    %c0_i32_1 = arith.constant 0 : i32
    return %c0_i32, %c0_i32_0 : i32, i32
  }
  func.func @transform_4(%arg0: i32) -> (i32, i32) {
    %c0_i32 = arith.constant 0 : i32
    %c0_i32_0 = arith.constant 0 : i32
    %c0_i32_1 = arith.constant 0 : i32
    return %c0_i32, %c0_i32_0 : i32, i32
  }
  func.func @transform_5(%arg0: i32) -> (i32, i32) {
    %c0_i32 = arith.constant 0 : i32
    %c0_i32_0 = arith.constant 0 : i32
    %c0_i32_1 = arith.constant 0 : i32
    return %c0_i32, %c0_i32_0 : i32, i32
  }
  func.func @transform_6(%arg0: i32) -> (i32, i32) {
    %c0_i32 = arith.constant 0 : i32
    %c0_i32_0 = arith.constant 0 : i32
    %c0_i32_1 = arith.constant 0 : i32
    return %c0_i32, %c0_i32_0 : i32, i32
  }
  func.func @transform_7(%arg0: i32) -> (i32, i32) {
    %c0_i32 = arith.constant 0 : i32
    %c0_i32_0 = arith.constant 0 : i32
    %c0_i32_1 = arith.constant 0 : i32
    return %c0_i32, %c0_i32_0 : i32, i32
  }
  func.func @transform_8(%arg0: i32) -> (i32, i32) {
    %c0_i32 = arith.constant 0 : i32
    %c0_i32_0 = arith.constant 0 : i32
    %c0_i32_1 = arith.constant 0 : i32
    return %c0_i32, %c0_i32_0 : i32, i32
  }
  func.func @transform_9(%arg0: i32) -> (i32, i32) {
    %c0_i32 = arith.constant 0 : i32
    %c0_i32_0 = arith.constant 0 : i32
    %c0_i32_1 = arith.constant 0 : i32
    return %c0_i32, %c0_i32_0 : i32, i32
  }
  func.func @transform_10(%arg0: i32) -> (i32, i32) {
    %c0_i32 = arith.constant 0 : i32
    %c0_i32_0 = arith.constant 0 : i32
    %c0_i32_1 = arith.constant 0 : i32
    return %c0_i32, %c0_i32_0 : i32, i32
  }
  func.func @transform_11(%arg0: i32) -> (i32, i32, i32) {
    %c0_i32 = arith.constant 0 : i32
    %c0_i32_0 = arith.constant 0 : i32
    %c0_i32_1 = arith.constant 0 : i32
    return %arg0, %c0_i32, %c0_i32_0 : i32, i32, i32
  }
}

</mosaic_0001>

<bundles_post_ra>
// kernel: tile.18
= control target key start
LH: loop header
LB: loop body
LE: loop exit
PB: predicated region body
PF: predicated region fallthrough
CT: control target
= control target key end

     0   :  { %s22_s0 = inlined_call_operand.vmem [shape: f32[4], index: 0, kind: input, shape index: {}]   ;;  %s23_s1 = inlined_call_operand.vmem [shape: f32[4,4], index: 1, kind: output, shape index: {}]  }
   0x1   :  { %v4_v0 = vld [vmem:[%s22_s0] ss:$0 sm:$0xff] }
   0x2   :  { %5 = vst [vmem:[%s23_s1] sm:$0xf] %v4_v0 }

// kernel: tile.0
= control target key start
LH: loop header
LB: loop body
LE: loop exit
PB: predicated region body
PF: predicated region fallthrough
CT: control target
= control target key end

     0   :  { %s34_s8 = smov 125   ;;  %s35_s9 = smov 126   ;;  %vm7_vm0 = vcmask 7168   ;;  %s61_s0 = inlined_call_operand.vmem [shape: f32[4,4], index: 0, kind: input, shape index: {}]   ;;  %s62_s1 = inlined_call_operand.vmem [shape: f32[16,1], index: 1, kind: output, shape index: {}]  }
   0x1   :  { %v4_v0 = vld [vmem:[%s61_s0] sm:$0xf]  ;;  %s33_s0 = smov 127  }
   0x2   :  { %5 = vst [vmem:[#allocation0] sm:$0xf] %v4_v0 }
   0x9   :  { %v9_v1 = vld [vmem:[#allocation0] sm:$0xf]  }
   0xa   :  { %v21_v2 = vld [vmem:[#allocation0] sm:$0xf]   ;;  %10 = vrot.lane.b32.xlu0 %v9_v1, %s33_s0 }
   0xb   :  { %22 = vrot.lane.b32.xlu1 %v21_v2, %s34_s8  ;;  %v15_v3 = vld [vmem:[#allocation0] sm:$0xf]  }
   0xc   :  { %v6_v4 = vld [vmem:[#allocation0] sm:$0xf]  }
   0xd   :  { %8 = vst.msk [vmem:[%s62_s1] ss:$4 sm:$0xf] %vm7_vm0, %v6_v4  }
  0x12   :  { %16 = vrot.lane.b32.xlu0 %v15_v3, %s35_s9 }
  0x7c   :  { %v11_v5 = vpop.permute.xlu0 %10  }
  0x7d   :  { %v23_v6 = vpop.permute.xlu1 %22   ;;  %27 = vst.msk [vmem:[%s62_s1 + $0x1] ss:$4 sm:$0xf] %vm7_vm0, %v11_v5  }
  0x7e   :  { %29 = vst.msk [vmem:[%s62_s1 + $0x3] ss:$4 sm:$0xf] %vm7_vm0, %v23_v6  }
  0x84   :  { %v17_v7 = vpop.permute.xlu0 %16  }
  0x85   :  { %28 = vst.msk [vmem:[%s62_s1 + $0x2] ss:$4 sm:$0xf] %vm7_vm0, %v17_v7  }

// kernel: unet_enc_forward.1
= control target key start
LH: loop header
LB: loop body
LE: loop exit
PB: predicated region body
PF: predicated region fallthrough
CT: control target
= control target key end

     0   :  { %s1242_s17 = smov 0   ;;  %s1482_s0 = inlined_call_operand.vmem [shape: f32[2,4,362], index: 0, kind: input, shape index: {}]   ;;  %s1483_s1 = inlined_call_operand.vmem [shape: f32[1,324], index: 1, kind: input, shape index: {}]   ;;  %s1484_s2 = inlined_call_operand.vmem [shape: bf16[8,36], index: 2, kind: input, shape index: {}]   ;;  %s1485_s3 = inlined_call_operand.vmem [shape: bf16[8,72], index: 3, kind: input, shape index: {}]   ;;  %s1486_s4 = inlined_call_operand.vmem [shape: bf16[16,8], index: 4, kind: input, shape index: {}]   ;;  %s1487_s5 = inlined_call_operand.vmem [shape: f32[8,1], index: 5, kind: input, shape index: {}]   ;;  %s1488_s6 = inlined_call_operand.vmem [shape: f32[8,1], index: 6, kind: input, shape index: {}]   ;;  %s1489_s7 = inlined_call_operand.vmem [shape: f32[8,1], index: 7, kind: input, shape index: {}]   ;;  %s1490_s8 = inlined_call_operand.vmem [shape: f32[8,1], index: 8, kind: input, shape index: {}]   ;;  %s1491_s9 = inlined_call_operand.vmem [shape: f32[16,1], index: 9, kind: input, shape index: {}]   ;;  %s1492_s10 = inlined_call_operand.vmem [shape: f32[16,1], index: 10, kind: input, shape index: {}]   ;;  %s1493_s11 = inlined_call_operand.vmem [shape: f32[2,16,324], index: 11, kind: output, shape index: {}]  }
   0x1 LB: > { %s1036_s18 = sadd.s32 4294967295, %s1169_s17   ;;  %p1040_p0 = scmp.ge.s32.totalorder %s1169_s17, 1  ;;  %s1169_s17 = sphi %s1242_s17, %s21_s17  }
   0x2   : > { %p337_p1 = scmp.lt.s32.totalorder %s1169_s17, 3 }
   0x4   : > { %p338_p2 = pnand %p1040_p0, %p337_p1 }
   0x5   : > { %p377_p3 = scmp.lt.s32.totalorder (!%p338_p2), %s1036_s18, 1  ;;  %s1171_s23 = smov (!%p338_p2), 127  }
   0x6   : > { %341 = sbr.rel (%p338_p2) target bundleno = 935 (0x3a7), region = 64  ;;  %s1172_s24 = smov (!%p338_p2), 126  }
   0x7   : > { %s1173_s25 = smov (!%p338_p2), 109   ;;  %s1174_s26 = smov (!%p338_p2), 108  }
   0x8   : > { %s1175_s27 = smov (!%p338_p2), 92   ;;  %s1176_s28 = smov (!%p338_p2), 91  }
   0x9   : > { %s1177_s29 = smov (!%p338_p2), 110   ;;  %s1178_s30 = smov (!%p338_p2), 90  }
   0xb   : > { %s1495_s18 = smov (!%p377_p3, %s1036_s18), 1  ;;  %v389_v46 = vld [vmem:[%s1487_s5] sm:$0xff]  ;;  %v1179_v48 = vmov 0   ;;  %vm491_vm0 = vcmask 883712   ;;  %vm472_vm1 = vcmask 891904   ;;  %vm528_vm2 = vcmask 744448  }
   0xc   : > { %s1059_s19 = smul.u32 12, %s1495_s18  ;;  %v390_v47 = vld [vmem:[%s1488_s6] sm:$0xff]  ;;  %1120 = vset.pattern.permute.xlu1 %v1179_v48  ;;  %1121 = vset.pattern.permute.xlu2 %v1179_v48  ;;  %vm546_vm3 = vcmask 736256   ;;  %vm509_vm4 = vcmask 752640   ;;  %vm578_vm5 = vcmask 1041408   ;;  %vm435_vm6 = vcmask 1031168  }
   0xd   : > { %1162 = vset.pattern.permute.xlu0 %v1179_v48  ;;  %vm417_vm7 = vcmask 1039360   ;;  %vm454_vm8 = vcmask 900096   ;;  %vm552_vm9 = vcmask 1043456   ;;  %vm574_vm10 = vcmask 293888  }
   0xe   : > { %s381_s22 = scalar_lea.vmem %s1482_s0, %s1059_s19  ;;  %vm648_vm11 = vcmask 867328   ;;  %vm676_vm12 = vcmask 1047704   ;;  %vm670_vm13 = vcmask 154624   ;;  %vm679_vm14 = vcmask 711680  }
   0xf   : > { %v391_v0 = vld [vmem:[%s381_s22] sm:$0xff]  ;;  %v392_v1 = vld [vmem:[%s381_s22 + $0x8] sm:$0xf]  ;;  %s1180_s22 = smov 19   ;;  %vm793_vm15 = vcmask 588800  }
  0x10   : > { %395 = vst [vmem:[#allocation1] ss:$2 sm:$0xff] %v391_v0 }
  0x11   : > { %397 = vst [vmem:[#allocation1 + $0x10] ss:$2 sm:$0xff] %v392_v1 }
  0x17   : > { %v1256_v2 = vld.sshfl [vmem:[#allocation1] sm:$0xff pattern:$0x75316420]  ;;  %v1258_v3 = vld.sshfl [vmem:[#allocation1 + $0x8] sm:$0xff pattern:$0x75316420] }
  0x18   : > { %405 = vst [vmem:[#allocation1 + $0x1] ss:$2 sm:$0xff] %v391_v0  ;;  %v1260_v4 = vld.sshfl [vmem:[#allocation1 + $0x10] sm:$0xff pattern:$0x75316420] }
  0x19   : > { %407 = vst [vmem:[#allocation1 + $0x11] ss:$2 sm:$0xff] %v392_v1 }
  0x1f   : > { %v408_v5 = vld.sshfl [vmem:[#allocation1] sm:$0xff pattern:$0x75316420]  ;;  %v409_v6 = vld.sshfl [vmem:[#allocation1 + $0x8] sm:$0xff pattern:$0x75316420] }
  0x20   : > { %v1080_v7 = vpack.i.bf16 %v409_v6, %v408_v5  ;;  %423 = vst [vmem:[#allocation1] ss:$2 sm:$0xff] %v391_v0  ;;  %v410_v8 = vld.sshfl [vmem:[#allocation1 + $0x10] sm:$0xff pattern:$0x75316420] }
  0x21   : > { %415 = vrot.lane.b32.xlu2 %v410_v8, %s1171_s23  ;;  %425 = vst [vmem:[#allocation1 + $0x10] ss:$2 sm:$0xff] %v392_v1 }
  0x22   : > { %1081 = vrot.lane.b32.xlu1 %v1080_v7, %s1171_s23 }
  0x27   : > { %v426_v9 = vld.sshfl [vmem:[#allocation1] sm:$0xff pattern:$0x75316420]  ;;  %v427_v10 = vld.sshfl [vmem:[#allocation1 + $0x8] sm:$0xff pattern:$0x75316420] }
  0x28   : > { %442 = vst [vmem:[#allocation1 + $0x1] ss:$2 sm:$0xff] %v391_v0  ;;  %v1085_v11 = vpack.i.bf16 %v427_v10, %v426_v9  ;;  %v428_v12 = vld.sshfl [vmem:[#allocation1 + $0x10] sm:$0xff pattern:$0x75316420] }
  0x29   : > { %444 = vst [vmem:[#allocation1 + $0x11] ss:$2 sm:$0xff] %v392_v1 }
  0x2a   : > { %1086 = vrot.lane.b32.xlu0 %v1085_v11, %s1172_s24 }
  0x2f   : > { %v445_v13 = vld.sshfl [vmem:[#allocation1] sm:$0xff pattern:$0x75316420]  ;;  %v446_v14 = vld.sshfl [vmem:[#allocation1 + $0x8] sm:$0xff pattern:$0x75316420] }
  0x30   : > { %460 = vst [vmem:[#allocation1] ss:$2 sm:$0xff] %v391_v0  ;;  %v447_v15 = vld.sshfl [vmem:[#allocation1 + $0x10] sm:$0xff pattern:$0x75316420]  ;;  %v1110_v32 = vpack.i.bf16 %v446_v14, %v445_v13 }
  0x31   : > { %462 = vst [vmem:[#allocation1 + $0x10] ss:$2 sm:$0xff] %v392_v1 }
  0x37   : > { %v463_v16 = vld.sshfl [vmem:[#allocation1] sm:$0xff pattern:$0x75316420]  ;;  %v464_v17 = vld.sshfl [vmem:[#allocation1 + $0x8] sm:$0xff pattern:$0x75316420] }
  0x38   : > { %v1090_v18 = vpack.i.bf16 %v464_v17, %v463_v16  ;;  %479 = vst [vmem:[#allocation1 + $0x1] ss:$2 sm:$0xff] %v391_v0  ;;  %v465_v19 = vld.sshfl [vmem:[#allocation1 + $0x10] sm:$0xff pattern:$0x75316420] }
  0x39   : > { %481 = vst [vmem:[#allocation1 + $0x11] ss:$2 sm:$0xff] %v392_v1 }
  0x3a   : > { %1091 = vrot.lane.b32.xlu1 %v1090_v18, %s1173_s25 }
  0x3f   : > { %v482_v20 = vld.sshfl [vmem:[#allocation1] sm:$0xff pattern:$0x75316420]  ;;  %v483_v21 = vld.sshfl [vmem:[#allocation1 + $0x8] sm:$0xff pattern:$0x75316420] }
  0x40   : > { %v484_v22 = vld.sshfl [vmem:[#allocation1 + $0x10] sm:$0xff pattern:$0x75316420]  ;;  %v1095_v23 = vpack.i.bf16 %v483_v21, %v482_v20  ;;  %497 = vst [vmem:[#allocation1] ss:$2 sm:$0xff] %v391_v0 }
  0x41   : > { %499 = vst [vmem:[#allocation1 + $0x10] ss:$2 sm:$0xff] %v392_v1 }
  0x42   : > { %470 = vrot.lane.b32.xlu1 %v465_v19, %s1173_s25  ;;  %1096 = vrot.lane.b32.xlu2 %v1095_v23, %s1174_s26 }
  0x47   : > { %v500_v24 = vld.sshfl [vmem:[#allocation1] sm:$0xff pattern:$0x75316420]  ;;  %v501_v25 = vld.sshfl [vmem:[#allocation1 + $0x8] sm:$0xff pattern:$0x75316420] }
  0x48   : > { %v502_v26 = vld.sshfl [vmem:[#allocation1 + $0x10] sm:$0xff pattern:$0x75316420]  ;;  %v1100_v27 = vpack.i.bf16 %v501_v25, %v500_v24  ;;  %516 = vst [vmem:[#allocation1 + $0x1] ss:$2 sm:$0xff] %v391_v0 }
  0x49   : > { %518 = vst [vmem:[#allocation1 + $0x11] ss:$2 sm:$0xff] %v392_v1 }
  0x4a   : > { %507 = vrot.lane.b32.xlu1 %v502_v26, %s1175_s27  ;;  %489 = vrot.lane.b32.xlu2 %v484_v22, %s1174_s26 }
  0x4b   : > { %1101 = vrot.lane.b32.xlu0 %v1100_v27, %s1175_s27 }
  0x4f   : > { %v519_v28 = vld.sshfl [vmem:[#allocation1] sm:$0xff pattern:$0x75316420]  ;;  %v520_v29 = vld.sshfl [vmem:[#allocation1 + $0x8] sm:$0xff pattern:$0x75316420] }
  0x50   : > { %v521_v30 = vld.sshfl [vmem:[#allocation1 + $0x10] sm:$0xff pattern:$0x75316420]  ;;  %v1105_v31 = vpack.i.bf16 %v520_v29, %v519_v28  ;;  %534 = vst [vmem:[#allocation1] ss:$2 sm:$0xff] %v391_v0 }
  0x51   : > { %536 = vst [vmem:[#allocation1 + $0x10] ss:$2 sm:$0xff] %v392_v1 }
  0x52   : > { %433 = vrot.lane.b32.xlu1 %v428_v12, %s1172_s24  ;;  %1106 = vrot.lane.b32.xlu2 %v1105_v31, %s1176_s28 }
  0x53   : > { %526 = vrot.lane.b32.xlu0 %v521_v30, %s1176_s28 }
  0x57   : > { %v537_v33 = vld.sshfl [vmem:[#allocation1] sm:$0xff pattern:$0x75316420]  ;;  %v538_v34 = vld.sshfl [vmem:[#allocation1 + $0x8] sm:$0xff pattern:$0x75316420] }
  0x58   : > { %v1115_v35 = vpack.i.bf16 %v538_v34, %v537_v33  ;;  %v539_v36 = vld.sshfl [vmem:[#allocation1 + $0x10] sm:$0xff pattern:$0x75316420] }
  0x5a   : > { %1111 = vrot.lane.b32.xlu2 %v1110_v32, %s1177_s29  ;;  %629 = vperm.xlu1 %1120, %v389_v46  }
  0x5b   : > { %1116 = vrot.lane.b32.xlu0 %v1115_v35, %s1178_s30 }
  0x62   : > { %637 = vperm.xlu2 %1121, %v390_v47  }
  0x63   : > { %544 = vrot.lane.b32.xlu0 %v539_v36, %s1178_s30 }
  0x6b   : > { %452 = vrot.lane.b32.xlu0 %v447_v15, %s1177_s29 }
  0x7b   : > { %v1278_v37 = vpop.permute.xlu2 %415 }
  0x94   : > { %v1282_v39 = vpop.permute.xlu1 %1081 }
  0x95   : > { %v1084_v58 = vunpack.i.h.bf16 %v1282_v39  ;;  %v1083_v59 = vunpack.i.l.bf16 %v1282_v39 }
  0x97   : > { %v418_v14 = vsel %vm417_vm7, %v1083_v59, %v1084_v58 }
  0x98   : > { %v553_v21 = vsel %vm552_vm9, %v1256_v2, %v418_v14 }
  0x9c   : > { %v1280_v38 = vpop.permute.xlu2 %1096  ;;  %v1284_v40 = vpop.permute.xlu0 %1086 }
  0x9d   : > { %v1099_v50 = vunpack.i.h.bf16 %v1280_v38  ;;  %v1098_v51 = vunpack.i.l.bf16 %v1280_v38  ;;  %v1089_v62 = vunpack.i.h.bf16 %v1284_v40  ;;  %v1088_v63 = vunpack.i.l.bf16 %v1284_v40 }
  0x9f   : > { %v492_v6 = vsel %vm491_vm0, %v1098_v51, %v1099_v50  ;;  %v436_v18 = vsel %vm435_vm6, %v1088_v63, %v1089_v62 }
  0xa4   : > { %v1286_v41 = vpop.permute.xlu2 %489 }
  0xa5   : > { %v493_v26 = vsel %vm491_vm0, %v1099_v50, %v1286_v41 }
  0xac   : > { %v1288_v42 = vpop.permute.xlu1 %1091  ;;  %v1107_v44 = vpop.permute.xlu2 %1106 }
  0xad   : > { %v1094_v52 = vunpack.i.h.bf16 %v1288_v42  ;;  %v1093_v53 = vunpack.i.l.bf16 %v1288_v42  ;;  %v1109_v54 = vunpack.i.h.bf16 %v1107_v44  ;;  %v1108_v55 = vunpack.i.l.bf16 %v1107_v44 }
  0xae   : > { %v419_v42 = vsel %vm417_vm7, %v1084_v58, %v1278_v37  ;;  %v555_v44 = vsel %vm552_vm9, %v1260_v4, %v1278_v37 }
  0xaf   : > { %v473_v5 = vsel %vm472_vm1, %v1093_v53, %v1094_v52  ;;  %v529_v7 = vsel %vm528_vm2, %v1108_v55, %v1109_v54  ;;  %v650_v53 = vld [vmem:[%s1483_s1] sm:$0x7] }
  0xb0   : > { %v559_v16 = vsel %vm552_vm9, %v473_v5, %v492_v6 }
  0xb4   : > { %v471_v49 = vpop.permute.xlu1 %470  ;;  %v1308_v60 = vpop.permute.xlu2 %1111 }
  0xb5   : > { %v1114_v8 = vunpack.i.h.bf16 %v1308_v60  ;;  %v1113_v9 = vunpack.i.l.bf16 %v1308_v60  ;;  %v474_v27 = vsel %vm472_vm1, %v1094_v52, %v471_v49  ;;  %v561_v30 = vsel %vm552_vm9, %v471_v49, %v1286_v41  ;;  %v388_v41 = vld [vmem:[%s1484_s2] sm:$0xf] }
  0xb6   : > { %v560_v39 = vsel %vm552_vm9, %v474_v27, %v493_v26  ;;  %v554_v49 = vsel %vm552_vm9, %v1258_v3, %v419_v42  ;;  %v652_v3 = vperm.slane %v650_v53, 0 }
  0xb7   : > { %v455_v19 = vsel %vm454_vm8, %v1113_v9, %v1114_v8 }
  0xb8   : > { %v556_v29 = vsel %vm552_vm9, %v436_v18, %v455_v19 }
  0xb9   : > { %v565_v35 = vpack.c.bf16 %v556_v29, %v553_v21  ;;  %v683_v21 = vld [vmem:[%s1490_s8] sm:$0xff] }
  0xbc   : > { %v508_v12 = vpop.permute.xlu1 %507  ;;  %v638_v52 = vpop.permute.xlu2 %637 }
  0xbd   : > { %v1290_v43 = vpop.permute.xlu0 %1101 }
  0xbe   : > { %v1104_v56 = vunpack.i.h.bf16 %v1290_v43  ;;  %v1103_v57 = vunpack.i.l.bf16 %v1290_v43 }
  0xc0   : > { %v510_v11 = vsel %vm509_vm4, %v1103_v57, %v1104_v56  ;;  %v511_v32 = vsel %vm509_vm4, %v1104_v56, %v508_v12 }
  0xc1   : > { %v562_v17 = vsel %vm552_vm9, %v510_v11, %v529_v7 }
  0xc2   : > { %v568_v24 = vpack.c.bf16 %v562_v17, %v559_v16 }
  0xc4   : > { %v434_v36 = vpop.permute.xlu1 %433 }
  0xc5   : > { %v1292_v45 = vpop.permute.xlu0 %526 }
  0xc6   : > { %v530_v22 = vsel %vm528_vm2, %v1109_v54, %v1292_v45  ;;  %v564_v2 = vsel %vm552_vm9, %v508_v12, %v1292_v45  ;;  %v437_v45 = vsel %vm435_vm6, %v1089_v62, %v434_v36  ;;  %v653_v62 = vperm.slane %v650_v53, 1 }
  0xc7   : > { %v563_v34 = vsel %vm552_vm9, %v511_v32, %v530_v22  ;;  %v570_v38 = vpack.c.bf16 %v564_v2, %v561_v30  ;;  %v1181_v12 = vmov 0.0   ;;  %v682_v22 = vld [vmem:[%s1489_s7] sm:$0xff] }
  0xc8   : > { %v569_v40 = vpack.c.bf16 %v563_v34, %v560_v39  ;;  %649 = vst.msk [vmem:[#allocation2 + $0x10] sm:$0xff] %vm648_vm11, %v1181_v12 }
  0xc9   : > { %646 = vst [vmem:[#allocation2] sm:$0xff] %v1181_v12 }
  0xcc   : > { %v630_v4 = vpop.permute.xlu1 %629 }
  0xcd   : > { %v1117_v61 = vpop.permute.xlu0 %1116 }
  0xce   : > { %v1119_v0 = vunpack.i.h.bf16 %v1117_v61  ;;  %v1118_v1 = vunpack.i.l.bf16 %v1117_v61 }
  0xd0   : > { %v547_v10 = vsel %vm546_vm3, %v1118_v1, %v1119_v0 }
  0xd1   : > { %v571_v13 = vpack.c.bf16 %v547_v10, %v547_v10 }
  0xd3   : > { %v580_v15 = vsel %vm578_vm5, %v571_v13, 0 }
  0xd4   : > { %593 = vmatpush.bf16.msra.mxu0 %v580_v15 }
  0xd5   : > { %v545_v20 = vpop.permute.xlu0 %544 }
  0xd6   : > { %v548_v23 = vsel %vm546_vm3, %v1119_v0, %v545_v20  ;;  %v573_v25 = vpack.c.bf16 %v545_v20, %v545_v20 }
  0xd7   : > { %v572_v28 = vpack.c.bf16 %v548_v23, %v548_v23  ;;  %v950_v23 = vld [vmem:[%s1492_s10] sm:$0xff] }
  0xd8   : > { %594 = vmatpush.bf16.msra.mxu0 %v568_v24  ;;  %v586_v31 = vsel %vm578_vm5, %v573_v25, 0  ;;  %v933_v24 = vld [vmem:[%s1491_s9 + $0x8] sm:$0xff] }
  0xd9   : > { %619 = vmatpush.bf16.msra.mxu2 %v586_v31  ;;  %v583_v33 = vsel %vm578_vm5, %v572_v28, 0  ;;  %v951_v25 = vld [vmem:[%s1492_s10 + $0x8] sm:$0xff] }
  0xda   : > { %606 = vmatpush.bf16.msra.mxu1 %v583_v33 }
  0xdc   : > { %595 = vmatpush.bf16.msra.mxu0 %v565_v35 }
  0xdd   : > { %620 = vmatpush.bf16.msra.mxu2 %v570_v38  ;;  %v453_v43 = vpop.permute.xlu0 %452 }
  0xde   : > { %v456_v46 = vsel %vm454_vm8, %v1114_v8, %v453_v43  ;;  %v558_v47 = vsel %vm552_vm9, %v434_v36, %v453_v43  ;;  %607 = vmatpush.bf16.msra.mxu1 %v569_v40  ;;  %v654_v8 = vperm.slane %v650_v53, 2 }
  0xdf   : > { %1043 = vmatmul.msk.bf16.vlgmr.msra.gmra.mxu0 %vm574_vm10, %v388_v41  ;;  %v567_v48 = vpack.c.bf16 %v558_v47, %v555_v44  ;;  %v557_v50 = vsel %vm552_vm9, %v437_v45, %v456_v46 }
  0xe0   : > { %v566_v51 = vpack.c.bf16 %v557_v50, %v554_v49 }
  0xe1   : > { %621 = vmatpush.bf16.msra.mxu2 %v567_v48 }
  0xe2   : > { %608 = vmatpush.bf16.msra.mxu1 %v566_v51 }
  0xe4   : > { %1045 = vmatmul.msk.bf16.vlgmr.msra.gmra.mxu2 %vm574_vm10, %v388_v41 }
  0xe5   : > { %1044 = vmatmul.msk.bf16.vlgmr.msra.gmra.mxu1 %vm574_vm10, %v388_v41 }
 0x15c   : > { %v597_v37 = vpop.f32.mrf.mxu0 }
 0x15d   : > { %v632_v54 = vmul.f32 %v630_v4, %v597_v37 }
 0x15f   : > { %v1363_v55 = vadd.f32 %v638_v52, %v632_v54 }
 0x161   : > { %v643_v56 = vmax.f32 %v1363_v55, 0.0 }
 0x162   : > { %v610_v57 = vpop.f32.mrf.mxu1 }
 0x163   : > { %v633_v58 = vmul.f32 %v630_v4, %v610_v57  ;;  %v658_v59 = vmul.f32 %v652_v3, %v643_v56 }
 0x164   : > { %v599_v60 = vpop.f32.mrf.mxu0 }
 0x165   : > { %v1368_v61 = vadd.f32 %v638_v52, %v633_v58  ;;  %664 = vrot.lane.b32.xlu0 %v658_v59, %s1180_s22 }
 0x167   : > { %v644_v63 = vmax.f32 %v1368_v61, 0.0  ;;  %v623_v0 = vpop.f32.mrf.mxu2 }
 0x168   : > { %v634_v1 = vmul.f32 %v630_v4, %v623_v0 }
 0x169   : > { %v659_v5 = vmul.f32 %v653_v62, %v644_v63 }
 0x16a   : > { %v1373_v6 = vadd.f32 %v638_v52, %v634_v1  ;;  %v612_v7 = vpop.f32.mrf.mxu1 }
 0x16b   : > { %666 = vrot.lane.b32.xlu1 %v659_v5, %s1180_s22 }
 0x16c   : > { %v645_v9 = vmax.f32 %v1373_v6, 0.0 }
 0x16e   : > { %v660_v10 = vmul.f32 %v654_v8, %v645_v9 }
 0x16f   : > { %v625_v11 = vpop.f32.mrf.mxu2 }
 0x170   : > { %668 = vrot.lane.b32.xlu2 %v660_v10, %s1180_s22  ;;  %s1060_s22 = smul.u32 48, %s1495_s18 }
 0x1ca   : > { %v669_v14 = vpop.permute.xlu2 %668 }
 0x1d7   : > { %v665_v13 = vpop.permute.xlu0 %664 }
 0x1d8   : > { %677 = vst.msk [vmem:[#allocation2] sm:$0xff] %vm676_vm12, %v665_v13 }
 0x1dd   : > { %v667_v15 = vpop.permute.xlu1 %666 }
 0x1de   : > { %v672_v16 = vsel %vm670_vm13, %v667_v15, %v669_v14  ;;  %v1378_v17 = vsel %vm670_vm13, %v665_v13, %v667_v15 }
 0x1df   : > { %680 = vst.msk [vmem:[#allocation2 + $0x10] sm:$0xff] %vm679_vm14, %v672_v16  ;;  %v1380_v18 = vld [vmem:[#allocation2] sm:$0xff] }
 0x1e0   : > { %v1132_v19 = vpack.i.bf16 %v1378_v17, %v1380_v18 }
 0x1e2   : > { %1133 = vrot.lane.b32.xlu2 %v1132_v19, %s1176_s28  ;;  %1128 = vrot.lane.b32.xlu1 %v1132_v19, %s1175_s27 }
 0x1e3   : > { %1123 = vrot.lane.b32.xlu0 %v1132_v19, %s1178_s30 }
 0x1e6   : > { %v1390_v20 = vld [vmem:[#allocation2 + $0x10] sm:$0xff] }
 0x1ea   : > { %1148 = vrot.lane.b32.xlu2 %v1132_v19, %s1172_s24  ;;  %1143 = vrot.lane.b32.xlu1 %v1132_v19, %s1174_s26 }
 0x1eb   : > { %1138 = vrot.lane.b32.xlu0 %v1132_v19, %s1173_s25 }
 0x1f2   : > { %771 = vrot.lane.b32.xlu2 %v1390_v20, %s1178_s30  ;;  %1158 = vrot.lane.b32.xlu1 %v1132_v19, %s1171_s23 }
 0x1f3   : > { %1153 = vrot.lane.b32.xlu0 %v1132_v19, %s1177_s29 }
 0x1fa   : > { %727 = vrot.lane.b32.xlu2 %v1390_v20, %s1173_s25  ;;  %760 = vrot.lane.b32.xlu1 %v1390_v20, %s1176_s28  ;;  %s386_s25 = scalar_lea.vmem %s1493_s11, %s1060_s22 }
 0x1fb   : > { %749 = vrot.lane.b32.xlu0 %v1390_v20, %s1175_s27 }
 0x202   : > { %716 = vrot.lane.b32.xlu2 %v1390_v20, %s1177_s29  ;;  %705 = vrot.lane.b32.xlu1 %v1390_v20, %s1172_s24 }
 0x203   : > { %738 = vrot.lane.b32.xlu0 %v1390_v20, %s1174_s26 }
 0x20a   : > { %855 = vperm.xlu2 %1121, %v683_v21   ;;  %847 = vperm.xlu1 %1120, %v682_v22   ;;  %v681_v22 = vld [vmem:[%s1485_s3] sm:$0xf] }
 0x20b   : > { %694 = vrot.lane.b32.xlu0 %v1390_v20, %s1171_s23 }
 0x212   : > { %954 = vperm.xlu2 %1121, %v950_v23   ;;  %941 = vperm.xlu1 %1120, %v933_v24  }
 0x21a   : > { %959 = vperm.xlu1 %1120, %v951_v25  }
 0x23c   : > { %v1134_v26 = vpop.permute.xlu2 %1133 }
 0x23d   : > { %v1136_v39 = vunpack.i.h.bf16 %v1134_v26  ;;  %v1135_v40 = vunpack.i.l.bf16 %v1134_v26 }
 0x23f   : > { %v762_v50 = vsel %vm528_vm2, %v1135_v40, %v1136_v39 }
 0x244   : > { %v1425_v27 = vpop.permute.xlu2 %1148 }
 0x245   : > { %v1151_v3 = vunpack.i.h.bf16 %v1425_v27  ;;  %v1150_v57 = vunpack.i.l.bf16 %v1425_v27 }
 0x247   : > { %v707_v5 = vsel %vm435_vm6, %v1150_v57, %v1151_v3 }
 0x24c   : > { %v772_v28 = vpop.permute.xlu2 %771 }
 0x24d   : > { %v792_v29 = vpack.c.bf16 %v772_v28, %v772_v28 }
 0x24f   : > { %v804_v30 = vsel %vm552_vm9, %v792_v29, 0 }
 0x250   : > { %835 = vmatpush.bf16.msrb.mxu1 %v804_v30 }
 0x254   : > { %v1129_v2 = vpop.permute.xlu1 %1128  ;;  %v728_v19 = vpop.permute.xlu2 %727 }
 0x255   : > { %v1124_v31 = vpop.permute.xlu0 %1123  ;;  %v1131_v34 = vunpack.i.h.bf16 %v1129_v2  ;;  %v1130_v35 = vunpack.i.l.bf16 %v1129_v2 }
 0x256   : > { %v1126_v32 = vunpack.i.h.bf16 %v1124_v31  ;;  %v1125_v33 = vunpack.i.l.bf16 %v1124_v31 }
 0x257   : > { %v751_v45 = vsel %vm509_vm4, %v1130_v35, %v1131_v34 }
 0x258   : > { %v773_v36 = vsel %vm546_vm3, %v1125_v33, %v1126_v32  ;;  %v774_v38 = vsel %vm546_vm3, %v1126_v32, %v772_v28  ;;  %v787_v37 = vpack.c.bf16 %v762_v50, %v751_v45 }
 0x259   : > { %v790_v41 = vpack.c.bf16 %v773_v36, %v773_v36  ;;  %v791_v42 = vpack.c.bf16 %v774_v38, %v774_v38  ;;  %v932_v36 = vld [vmem:[%s1491_s9] sm:$0xff] }
 0x25a   : > { %936 = vperm.xlu0 %1162, %v932_v36  }
 0x25b   : > { %v798_v43 = vsel %vm552_vm9, %v790_v41, 0  ;;  %v801_v44 = vsel %vm552_vm9, %v791_v42, 0 }
 0x25c   : > { %809 = vmatpush.bf16.msra.mxu3 %v798_v43  ;;  %822 = vmatpush.bf16.msrb.mxu0 %v801_v44  ;;  %v1144_v46 = vpop.permute.xlu1 %1143  ;;  %v717_v29 = vpop.permute.xlu2 %716 }
 0x25d   : > { %v1146_v47 = vunpack.i.h.bf16 %v1144_v46  ;;  %v1145_v48 = vunpack.i.l.bf16 %v1144_v46  ;;  %v1139_v49 = vpop.permute.xlu0 %1138 }
 0x25e   : > { %v1141_v51 = vunpack.i.h.bf16 %v1139_v49  ;;  %v1140_v4 = vunpack.i.l.bf16 %v1139_v49 }
 0x25f   : > { %v740_v52 = vsel %vm491_vm0, %v1145_v48, %v1146_v47 }
 0x260   : > { %810 = vmatpush.bf16.msra.mxu3 %v787_v37  ;;  %v729_v53 = vsel %vm472_vm1, %v1140_v4, %v1141_v51  ;;  %v730_v26 = vsel %vm472_vm1, %v1141_v51, %v728_v19  ;;  %vm976_vm1 = vcmask 556032  }
 0x261   : > { %v784_v54 = vpack.c.bf16 %v740_v52, %v729_v53 }
 0x264   : > { %811 = vmatpush.bf16.msra.mxu3 %v784_v54  ;;  %v1159_v58 = vpop.permute.xlu1 %1158  ;;  %v856_v41 = vpop.permute.xlu2 %855 }
 0x265   : > { %v1154_v59 = vpop.permute.xlu0 %1153  ;;  %v1161_v60 = vunpack.i.h.bf16 %v1159_v58  ;;  %v1160_v62 = vunpack.i.l.bf16 %v1159_v58 }
 0x266   : > { %v1156_v0 = vunpack.i.h.bf16 %v1154_v59  ;;  %v1155_v1 = vunpack.i.l.bf16 %v1154_v59 }
 0x267   : > { %v696_v10 = vsel %vm417_vm7, %v1160_v62, %v1161_v60 }
 0x268   : > { %v718_v7 = vsel %vm454_vm8, %v1155_v1, %v1156_v0  ;;  %v778_v14 = vpack.c.bf16 %v696_v10, %v1380_v18  ;;  %v719_v2 = vsel %vm454_vm8, %v1156_v0, %v717_v29 }
 0x269   : > { %v781_v8 = vpack.c.bf16 %v718_v7, %v707_v5 }
 0x26b   : > { %812 = vmatpush.bf16.msra.mxu3 %v781_v8 }
 0x26c   : > { %v761_v11 = vpop.permute.xlu1 %760  ;;  %v955_v61 = vpop.permute.xlu2 %954 }
 0x26d   : > { %v763_v12 = vsel %vm528_vm2, %v1136_v39, %v761_v11  ;;  %v750_v13 = vpop.permute.xlu0 %749 }
 0x26e   : > { %v752_v15 = vsel %vm509_vm4, %v1131_v34, %v750_v13  ;;  %v789_v16 = vpack.c.bf16 %v761_v11, %v750_v13 }
 0x26f   : > { %813 = vmatpush.bf16.msra.mxu3 %v778_v14  ;;  %v788_v21 = vpack.c.bf16 %v763_v12, %v752_v15 }
 0x270   : > { %836 = vmatpush.bf16.msrb.mxu1 %v789_v16 }
 0x271   : > { %823 = vmatpush.bf16.msrb.mxu0 %v788_v21 }
 0x272   : > { %1046 = vmatmul.msk.bf16.vlgmr.msra.gmra.mxu3 %vm793_vm15, %v681_v22 }
 0x274   : > { %v706_v23 = vpop.permute.xlu1 %705 }
 0x275   : > { %v739_v24 = vpop.permute.xlu0 %738  ;;  %v708_v28 = vsel %vm435_vm6, %v1151_v3, %v706_v23  ;;  %v783_v30 = vpack.c.bf16 %v717_v29, %v706_v23 }
 0x276   : > { %v741_v25 = vsel %vm491_vm0, %v1146_v47, %v739_v24  ;;  %v786_v18 = vpack.c.bf16 %v739_v24, %v728_v19  ;;  %v782_v31 = vpack.c.bf16 %v719_v2, %v708_v28  ;;  %v1058_v47 = vld [vmem:[%s1486_s4] sm:$0xff]  ;;  %vm877_vm0 = vcmask 64512  }
 0x277   : > { %v785_v27 = vpack.c.bf16 %v741_v25, %v730_v26 }
 0x278   : > { %837 = vmatpush.bf16.msrb.mxu1 %v786_v18 }
 0x279   : > { %824 = vmatpush.bf16.msrb.mxu0 %v785_v27 }
 0x27c   : > { %838 = vmatpush.bf16.msrb.mxu1 %v783_v30  ;;  %v848_v38 = vpop.permute.xlu1 %847 }
 0x27d   : > { %v695_v32 = vpop.permute.xlu0 %694  ;;  %825 = vmatpush.bf16.msrb.mxu0 %v782_v31 }
 0x27e   : > { %v697_v33 = vsel %vm417_vm7, %v1161_v60, %v695_v32  ;;  %v780_v34 = vpack.c.bf16 %v695_v32, %v1390_v20 }
 0x27f   : > { %v779_v35 = vpack.c.bf16 %v697_v33, %v1378_v17 }
 0x280   : > { %839 = vmatpush.bf16.msrb.mxu1 %v780_v34 }
 0x281   : > { %826 = vmatpush.bf16.msrb.mxu0 %v779_v35 }
 0x283   : > { %1048 = vmatmul.msk.bf16.vlgmr.msrb.gmra.mxu1 %vm793_vm15, %v681_v22 }
 0x284   : > { %1047 = vmatmul.msk.bf16.vlgmr.msrb.gmra.mxu0 %vm793_vm15, %v681_v22  ;;  %v942_v6 = vpop.permute.xlu1 %941 }
 0x28c   : > { %v960_v7 = vpop.permute.xlu1 %959 }
 0x2cc   : > { %v937_v60 = vpop.permute.xlu0 %936 }
 0x2f5   : > { %v815_v39 = vpop.f32.mrf.mxu3 }
 0x2f6   : > { %v850_v40 = vmul.f32 %v848_v38, %v815_v39 }
 0x2f8   : > { %v858_v42 = vadd.f32 %v856_v41, %v850_v40 }
 0x2fa   : > { %v861_v43 = vmax.f32 %v858_v42, 0.0 }
 0x2fc   : > { %v864_v17 = vadd.f32 %v861_v43, %v643_v56 }
 0x2fd   : > { %v817_v20 = vpop.f32.mrf.mxu3 }
 0x2fe   : > { %v869_v44 = vpack.c.bf16 %v864_v17, %v864_v17 }
 0x300   : > { %v841_v45 = vpop.f32.mrf.mxu1  ;;  %v882_v46 = vsel %vm552_vm9, %v869_v44, 0 }
 0x301   : > { %v852_v48 = vmul.f32 %v848_v38, %v841_v45  ;;  %v828_v49 = vpop.f32.mrf.mxu0  ;;  %897 = vmatpush.bf16.msrb.mxu2 %v882_v46 }
 0x302   : > { %v851_v50 = vmul.f32 %v848_v38, %v828_v49 }
 0x303   : > { %v860_v51 = vadd.f32 %v856_v41, %v852_v48 }
 0x304   : > { %v859_v4 = vadd.f32 %v856_v41, %v851_v50  ;;  %1053 = vmatmul.msk.bf16.vlgmr.msrb.gmra.mxu2 %vm877_vm0, %v1058_v47 }
 0x305   : > { %v863_v55 = vmax.f32 %v860_v51, 0.0 }
 0x306   : > { %v862_v56 = vmax.f32 %v859_v4, 0.0 }
 0x307   : > { %v866_v37 = vadd.f32 %v863_v55, %v645_v9 }
 0x308   : > { %v843_v52 = vpop.f32.mrf.mxu1  ;;  %v865_v53 = vadd.f32 %v862_v56, %v644_v63 }
 0x309   : > { %v830_v54 = vpop.f32.mrf.mxu0  ;;  %v871_v3 = vpack.c.bf16 %v866_v37, %v866_v37 }
 0x30a   : > { %v870_v57 = vpack.c.bf16 %v865_v53, %v865_v53 }
 0x30b   : > { %v888_v58 = vsel %vm552_vm9, %v871_v3, 0 }
 0x30c   : > { %925 = vmatpush.bf16.msra.mxu2 %v888_v58  ;;  %v885_v59 = vsel %vm552_vm9, %v870_v57, 0 }
 0x30d   : > { %911 = vmatpush.bf16.msrb.mxu3 %v885_v59 }
 0x310   : > { %1054 = vmatmul.msk.bf16.vlgmr.msrb.gmra.mxu3 %vm877_vm0, %v1058_v47 }
 0x314   : > { %1055 = vmatmul.msk.bf16.vlgmr.msra.gmra.mxu2 %vm877_vm0, %v1058_v47 }
 0x387   : > { %v899_v9 = vpop.f32.mrf.mxu2 }
 0x388   : > { %v944_v62 = vmul.f32 %v937_v60, %v899_v9 }
 0x38a   : > { %v962_v63 = vadd.f32 %v955_v61, %v944_v62 }
 0x38c   : > { %v968_v0 = vmax.f32 %v962_v63, 0.0 }
 0x38e   : > { %974 = vst [vmem:[%s386_s25] sm:$0xff] %v968_v0 }
 0x38f   : > { %v901_v1 = vpop.f32.mrf.mxu2 }
 0x390   : > { %v947_v5 = vmul.f32 %v942_v6, %v901_v1 }
 0x392   : > { %v965_v8 = vadd.f32 %v960_v7, %v947_v5 }
 0x393   : > { %v913_v10 = vpop.f32.mrf.mxu3 }
 0x394   : > { %v971_v11 = vmax.f32 %v965_v8, 0.0  ;;  %v945_v12 = vmul.f32 %v937_v60, %v913_v10 }
 0x396   : > { %978 = vst [vmem:[%s386_s25 + $0x18] sm:$0xff] %v971_v11  ;;  %v963_v13 = vadd.f32 %v955_v61, %v945_v12 }
 0x397   : > { %v927_v14 = vpop.f32.mrf.mxu2 }
 0x398   : > { %v969_v15 = vmax.f32 %v963_v13, 0.0  ;;  %v946_v16 = vmul.f32 %v937_v60, %v927_v14 }
 0x39a   : > { %975 = vst [vmem:[%s386_s25 + $0x8] sm:$0xff] %v969_v15  ;;  %v964_v19 = vadd.f32 %v955_v61, %v946_v16 }
 0x39b   : > { %v915_v21 = vpop.f32.mrf.mxu3 }
 0x39c   : > { %v970_v22 = vmax.f32 %v964_v19, 0.0  ;;  %v948_v23 = vmul.f32 %v942_v6, %v915_v21 }
 0x39e   : > { %977 = vst.msk [vmem:[%s386_s25 + $0x10] sm:$0xff] %vm976_vm1, %v970_v22  ;;  %v966_v24 = vadd.f32 %v960_v7, %v948_v23 }
 0x39f   : > { %v929_v25 = vpop.f32.mrf.mxu2 }
 0x3a0   : > { %v972_v18 = vmax.f32 %v966_v24, 0.0  ;;  %v949_v26 = vmul.f32 %v942_v6, %v929_v25 }
 0x3a2   : > { %979 = vst [vmem:[%s386_s25 + $0x20] sm:$0xff] %v972_v18  ;;  %v967_v27 = vadd.f32 %v960_v7, %v949_v26 }
 0x3a4   : > { %v973_v28 = vmax.f32 %v967_v27, 0.0 }
 0x3a6   : > { %980 = vst.msk [vmem:[%s386_s25 + $0x28] sm:$0xff] %vm976_vm1, %v973_v28 }
 0x3a7 PF: > { %s21_s17 = sadd.s32 1, %s1169_s17  }
 0x3a8   : > { %p18_p4 = scmp.ge.s32.totalorder %s21_s17, 4  }
 0x3aa   :  { %20 = sbr.rel (!%p18_p4) target bundleno = 1 (0x1), region = 107 }

</bundles_post_ra>
